<compile_context>
chip_gen: v5e
topology: v5e:2x2
jax: 0.10.0
libtpu: 0.0.40
codegen_flags: <defaults>
</compile_context>

<pallas_src>
import functools

import jax
import jax.numpy as jnp
from jax import lax
from jax.experimental import pallas as pl
from jax.experimental.pallas import tpu as pltpu

_LANE = 128
_MAX_LANE_TILE = 2048
_TARGET_BLOCK_BYTES = 2 * 1024 * 1024  # ~2 MiB per block (sweet spot, all chips)


def _dropout_kernel(seed_ref, x_ref, o_ref, *, threshold, scale, lanes, row_tile):
    """Keep element iff hash(global_flat_index, seed) >= threshold  (P = 1 - rate)."""
    shape = x_ref.shape
    row_off = (pl.program_id(0) * row_tile).astype(jnp.uint32)
    rows = lax.broadcasted_iota(jnp.int32, shape, 0).astype(jnp.uint32)
    cols = lax.broadcasted_iota(jnp.int32, shape, 1).astype(jnp.uint32)
    idx = (rows + row_off) * jnp.uint32(lanes) + cols

    # Seeded murmur3 finalizer — pure 32-bit integer VPU ops, wraps mod 2^32.
    h = idx ^ (seed_ref[0].astype(jnp.uint32) * jnp.uint32(0x9E3779B1))
    h = h ^ (h >> 16)
    h = h * jnp.uint32(0x85EBCA6B)
    h = h ^ (h >> 13)
    h = h * jnp.uint32(0xC2B2AE35)
    h = h ^ (h >> 16)

    keep = h >= jnp.uint32(threshold)  # P(keep) = 1 - rate
    scaled = x_ref[...].astype(jnp.float32) * scale  # f32 scale, cast once on store
    o_ref[...] = jnp.where(keep, scaled, 0.0).astype(o_ref.dtype)


def _plan_tiles(n, itemsize):
    """Pick (padded_rows, lane_width, row_tile) for a lane-dense 2-D slab."""
    if n <= _LANE:
        return 1, n, 1  # single tiny full-extent block
    lanes = min(_MAX_LANE_TILE, (n // _LANE) * _LANE)
    sublane = max(8, (8 * 4) // itemsize)  # 8 f32, 16 bf16, 32 int8/fp8
    row_tile = max(sublane,
                   (_TARGET_BLOCK_BYTES // (lanes * itemsize)) // sublane * sublane)
    rows = -(-n // lanes)  # cdiv
    if rows <= row_tile:
        return rows, lanes, rows  # one block; full-extent rows is always legal
    padded_rows = -(-rows // row_tile) * row_tile
    return padded_rows, lanes, row_tile


def dropout(x, dropout_rate, *, seed=0, training=True):
    """Inverted dropout matching DropoutLayer.forward (training / eval)."""
    rate = float(dropout_rate)
    if not training or rate <= 0.0:
        return x  # eval mode (or rate 0): identity, same as the PyTorch module
    if rate >= 1.0:
        # torch's formula divides by zero here; everything is dropped.
        return jnp.zeros_like(x)

    orig_shape = x.shape
    n = int(x.size)
    if n == 0:
        return x

    itemsize = jnp.dtype(x.dtype).itemsize
    padded_rows, lanes, row_tile = _plan_tiles(n, itemsize)
    n_pad = padded_rows * lanes

    flat = x.reshape(-1)
    if n_pad != n:
        flat = jnp.pad(flat, (0, n_pad - n))
    x2d = flat.reshape(padded_rows, lanes)

    threshold = min(int(rate * 4294967296.0), 4294967295)  # uint32(rate * 2^32)
    scale = 1.0 / (1.0 - rate)
    seed_arr = jnp.asarray([seed], dtype=jnp.int32)

    grid = (padded_rows // row_tile,)
    grid_spec = pltpu.PrefetchScalarGridSpec(
        num_scalar_prefetch=1,
        grid=grid,
        in_specs=[pl.BlockSpec((row_tile, lanes), lambda i, seed_ref: (i, 0))],
        out_specs=pl.BlockSpec((row_tile, lanes), lambda i, seed_ref: (i, 0)),
    )

    out2d = pl.pallas_call(
        functools.partial(_dropout_kernel, threshold=threshold, scale=scale,
                          lanes=lanes, row_tile=row_tile),
        out_shape=jax.ShapeDtypeStruct(x2d.shape, x2d.dtype),
        grid_spec=grid_spec,
        compiler_params=pltpu.CompilerParams(
            dimension_semantics=("parallel",),  # independent tiles -> megacore shards
        ),
    )(seed_arr, x2d)

    out = out2d.reshape(-1)
    if n_pad != n:
        out = out[:n]
    return out.reshape(orig_shape)


# TODO(synk): backward() / persistent self.mask are not part of this forward
# kernel; recompute the same hash-mask with the same seed for the grad pass.


if __name__ == "__main__":
    key = jax.random.PRNGKey(0)
    k1, k2, k3 = jax.random.split(key, 3)

    # MLP-style activations: batch=64, hidden=128.
    x = jax.random.normal(k1, (64, 128), dtype=jnp.float32)
    rate = 0.5
    scale = 1.0 / (1.0 - rate)
    y = jax.block_until_ready(dropout(x, rate, seed=1234, training=True))
    assert y.shape == x.shape and y.dtype == x.dtype
    kept = y != 0.0
    # surviving entries are scaled copies of x; dropped entries are exactly zero
    assert jnp.allclose(jnp.where(kept, y, 0.0),
                        jnp.where(kept, x * scale, 0.0), atol=1e-5, rtol=1e-5)
    keep_frac = float(jnp.mean(kept.astype(jnp.float32)))
    assert 0.40 < keep_frac < 0.60, keep_frac

    # bf16, 3-D input (flattened to a lane-dense slab internally)
    xb = jax.random.normal(k2, (4, 8, 32), dtype=jnp.bfloat16)
    yb = jax.block_until_ready(dropout(xb, 0.25, seed=7, training=True))
    assert yb.shape == xb.shape and yb.dtype == xb.dtype

    # odd / non-128-multiple shape (exercises the tiny-block / padding path)
    xo = jax.random.normal(k3, (3, 5, 7), dtype=jnp.float32)
    yo = jax.block_until_ready(dropout(xo, 0.1, seed=42, training=True))
    assert yo.shape == xo.shape and yo.dtype == xo.dtype
    kept_o = yo != 0.0
    assert jnp.allclose(jnp.where(kept_o, yo, 0.0),
                        jnp.where(kept_o, xo / 0.9, 0.0), atol=1e-5, rtol=1e-5)

    # eval mode: identity
    y_eval = jax.block_until_ready(dropout(x, rate, seed=1234, training=False))
    assert jnp.array_equal(y_eval, x)

    # rate >= 1.0: everything dropped (torch formula would divide by zero)
    y_all = jax.block_until_ready(dropout(x, 1.0, seed=0, training=True))
    assert not bool(jnp.any(y_all))

    print("KERNEL_OK")
</pallas_src>

<mosaic_0001>
module attributes {stable_mosaic.version = 11 : i64} {
  func.func @_dropout_kernel(%arg0: i32, %arg1: memref<1xi32, #tpu.memory_space<smem>>, %arg2: memref<4x2048xf32, #tpu.memory_space<vmem>>, %arg3: memref<4x2048xf32, #tpu.memory_space<vmem>>) attributes {dimension_semantics = [#tpu.dimension_semantics<parallel>], iteration_bounds = array<i64: 1>, scalar_prefetch = 1 : i64, scratch_operands = 0 : i64, tpu.core_type = #tpu.core_type<tc>, window_params = [{transform_indices = @transform_0, window_bounds = array<i64: 4, 2048>}, {transform_indices = @transform_1, window_bounds = array<i64: 4, 2048>}]} {
    %c4_i32 = arith.constant 4 : i32
    %0 = arith.muli %arg0, %c4_i32 : i32
    %1 = tpu.iota {dimensions = array<i32: 0>} : vector<4x2048xi32>
    %2 = tpu.iota {dimensions = array<i32: 1>} : vector<4x2048xi32>
    %3 = vector.broadcast %0 : i32 to vector<4x2048xi32>
    %4 = arith.addi %1, %3 : vector<4x2048xi32>
    %c2048_i32 = arith.constant 2048 : i32
    %5 = vector.broadcast %c2048_i32 : i32 to vector<4x2048xi32>
    %6 = arith.muli %4, %5 : vector<4x2048xi32>
    %7 = arith.addi %6, %2 : vector<4x2048xi32>
    %c0 = arith.constant 0 : index
    %8 = memref.load %arg1[%c0] : memref<1xi32, #tpu.memory_space<smem>>
    %c-1640531535_i32 = arith.constant -1640531535 : i32
    %9 = arith.muli %8, %c-1640531535_i32 : i32
    %10 = vector.broadcast %9 : i32 to vector<4x2048xi32>
    %11 = arith.xori %7, %10 : vector<4x2048xi32>
    %c16_i32 = arith.constant 16 : i32
    %12 = vector.broadcast %c16_i32 : i32 to vector<4x2048xi32>
    %13 = arith.shrui %11, %12 : vector<4x2048xi32>
    %14 = arith.xori %11, %13 : vector<4x2048xi32>
    %c-2048144789_i32 = arith.constant -2048144789 : i32
    %15 = vector.broadcast %c-2048144789_i32 : i32 to vector<4x2048xi32>
    %16 = arith.muli %14, %15 : vector<4x2048xi32>
    %c13_i32 = arith.constant 13 : i32
    %17 = vector.broadcast %c13_i32 : i32 to vector<4x2048xi32>
    %18 = arith.shrui %16, %17 : vector<4x2048xi32>
    %19 = arith.xori %16, %18 : vector<4x2048xi32>
    %c-1028477387_i32 = arith.constant -1028477387 : i32
    %20 = vector.broadcast %c-1028477387_i32 : i32 to vector<4x2048xi32>
    %21 = arith.muli %19, %20 : vector<4x2048xi32>
    %c16_i32_0 = arith.constant 16 : i32
    %22 = vector.broadcast %c16_i32_0 : i32 to vector<4x2048xi32>
    %23 = arith.shrui %21, %22 : vector<4x2048xi32>
    %24 = arith.xori %21, %23 : vector<4x2048xi32>
    %c-2147483648_i32 = arith.constant -2147483648 : i32
    %25 = vector.broadcast %c-2147483648_i32 : i32 to vector<4x2048xi32>
    %26 = arith.cmpi uge, %24, %25 : vector<4x2048xi32>
    %c0_1 = arith.constant 0 : index
    %c0_2 = arith.constant 0 : index
    %27 = vector.load %arg2[%c0_1, %c0_2] : memref<4x2048xf32, #tpu.memory_space<vmem>>, vector<4x2048xf32>
    %cst = arith.constant 2.000000e+00 : f32
    %28 = vector.broadcast %cst : f32 to vector<4x2048xf32>
    %29 = arith.mulf %27, %28 : vector<4x2048xf32>
    %cst_3 = arith.constant 0.000000e+00 : f32
    %30 = vector.broadcast %cst_3 : f32 to vector<4x2048xf32>
    %31 = arith.select %26, %29, %30 : vector<4x2048xi1>, vector<4x2048xf32>
    %c0_4 = arith.constant 0 : index
    %c0_5 = arith.constant 0 : index
    %32 = vector.load %arg3[%c0_4, %c0_5] : memref<4x2048xf32, #tpu.memory_space<vmem>>, vector<4x2048xf32>
    tpu.vector_store %arg3[%c0_4, %c0_5], %31 {strides = array<i32>} : memref<4x2048xf32, #tpu.memory_space<vmem>>, vector<4x2048xf32>,
    return
  }
  func.func @transform_0(%arg0: i32, %arg1: memref<1xi32, #tpu.memory_space<smem>>) -> (i32, i32) {
    %c0_i32 = arith.constant 0 : i32
    %c0_i32_0 = arith.constant 0 : i32
    return %arg0, %c0_i32 : i32, i32
  }
  func.func @transform_1(%arg0: i32, %arg1: memref<1xi32, #tpu.memory_space<smem>>) -> (i32, i32) {
    %c0_i32 = arith.constant 0 : i32
    %c0_i32_0 = arith.constant 0 : i32
    return %arg0, %c0_i32 : i32, i32
  }
}

</mosaic_0001>

<bundles_post_ra>
// kernel: tpu_custom_call.1
= control target key start
LH: loop header
LB: loop body
LE: loop exit
PB: predicated region body
PF: predicated region fallthrough
CT: control target
= control target key end

     0   :  { %8 = vsyncpa [#allocation5], 0  ;;  %s632_s0 = inlined_call_operand.<no memory space> [shape: s32[1], index: 0, kind: input, shape index: {}]   ;;  %s633_s1 = inlined_call_operand.hbm [shape: f32[4,2048], index: 1, kind: input, shape index: {}]   ;;  %s634_s2 = inlined_call_operand.hbm [shape: f32[4,2048], index: 2, kind: output, shape index: {}]  }
   0x1   :  { %9 = vsyncpa [#allocation6], 0  ;;  %s15_s11 = sshll.u32 %s633_s1, 4  ;;  %s478_s12 = smov [#allocation4]   ;;  %s16_s11 = int_to_ptr.hbm [resolvable:$true] %s15_s11 }
   0x2   :  { %s17_s13 = sshll.u32 %s478_s12, 4  ;;  %s18_s13 = int_to_ptr.vmem [resolvable:$true] %s17_s13 }
   0x3   :  { %20 = dma.hbm_to_vmem [thread:$0]  %s16_s11, 1024, %s18_s13, [#allocation5]  }
   0x4   :  { %474 = dma.done.wait [#allocation5], 1024  }
   0x5   :  { %475 = vsyncadd [#allocation5], 4294966272  ;;  %v26_v0 = vlaneseq  ;;  %s65_s16 = smul.u32 2654435761, %s632_s0  ;;  %v259_v16 = vld [vmem:[#allocation4] sm:$0xff]  ;;  %v260_v17 = vld [vmem:[#allocation4 + $0x8] sm:$0xff] }
   0x6   :  { %v261_v18 = vld [vmem:[#allocation4 + $0x10] sm:$0xff]  ;;  %v267_v23 = vmul.f32 2.0, %v259_v16  ;;  %v268_v24 = vmul.f32 2.0, %v260_v17  ;;  %v262_v26 = vld [vmem:[#allocation4 + $0x18] sm:$0xff]  ;;  %v263_v30 = vld [vmem:[#allocation4 + $0x20] sm:$0xff]  ;;  %vm366_vm0 = vcmask 1043456  }
   0x7   :  { %v27_v1 = vshrl.u32 %v26_v0, 7  ;;  %v501_v2 = vand.u32 127, %v26_v0  ;;  %v503_v3 = vstv %s65_s16  ;;  %v269_v25 = vmul.f32 2.0, %v261_v18  ;;  %v264_v31 = vld [vmem:[#allocation4 + $0x28] sm:$0xff]  ;;  %v265_v34 = vld [vmem:[#allocation4 + $0x30] sm:$0xff]  ;;  %v266_v35 = vld [vmem:[#allocation4 + $0x38] sm:$0xff] }
   0x8   :  { %v270_v28 = vmul.f32 2.0, %v262_v26  ;;  %283 = vst [vmem:[#allocation1] ss:$2 sm:$0xff] %v267_v23  ;;  %v271_v44 = vmul.f32 2.0, %v263_v30  ;;  %v272_v45 = vmul.f32 2.0, %v264_v31  ;;  %v273_v47 = vmul.f32 2.0, %v265_v34 }
   0x9   :  { %v30_v4 = vadd.s32 128, %v501_v2  ;;  %v506_v5 = vmul.u32 2048, %v27_v1  ;;  %v31_v6 = vadd.s32 256, %v501_v2  ;;  %v32_v7 = vadd.s32 384, %v501_v2  ;;  %285 = vst [vmem:[#allocation1 + $0x10] ss:$2 sm:$0xff] %v268_v24 }
   0xa   :  { %v33_v8 = vadd.s32 512, %v501_v2  ;;  %v34_v9 = vadd.s32 640, %v501_v2  ;;  %v35_v10 = vadd.s32 768, %v501_v2  ;;  %v36_v11 = vadd.s32 896, %v501_v2  ;;  %287 = vst [vmem:[#allocation1 + $0x20] ss:$2 sm:$0xff] %v269_v25 }
   0xb   :  { %v48_v12 = vadd.s32 %v506_v5, %v501_v2  ;;  %v49_v13 = vadd.s32 %v506_v5, %v30_v4  ;;  %v50_v14 = vadd.s32 %v506_v5, %v31_v6  ;;  %v51_v15 = vadd.s32 %v506_v5, %v32_v7  ;;  %289 = vst [vmem:[#allocation1 + $0x30] ss:$2 sm:$0xff] %v270_v28  ;;  %s479_s0 = smov [#allocation7]   ;;  %s398_s19 = sshll.u32 %s634_s2, 4  ;;  %s399_s19 = int_to_ptr.hbm [resolvable:$true] %s398_s19 }
   0xc   :  { %v52_v19 = vadd.s32 %v506_v5, %v33_v8  ;;  %v53_v20 = vadd.s32 %v506_v5, %v34_v9  ;;  %v54_v21 = vadd.s32 %v506_v5, %v35_v10  ;;  %v55_v22 = vadd.s32 %v506_v5, %v36_v11  ;;  %s396_s1 = sshll.u32 %s479_s0, 4  ;;  %s397_s1 = int_to_ptr.vmem [resolvable:$true] %s396_s1 }
   0xd   :  { %v67_v27 = vxor.u32 %v503_v3, %v48_v12  ;;  %v68_v29 = vxor.u32 %v503_v3, %v49_v13  ;;  %v69_v33 = vxor.u32 %v503_v3, %v50_v14  ;;  %v70_v37 = vxor.u32 %v503_v3, %v51_v15 }
   0xe   :  { %v71_v38 = vxor.u32 %v503_v3, %v52_v19  ;;  %v72_v39 = vxor.u32 %v503_v3, %v53_v20  ;;  %v73_v42 = vxor.u32 %v503_v3, %v54_v21  ;;  %v74_v43 = vxor.u32 %v503_v3, %v55_v22 }
   0xf   :  { %v83_v32 = vshrl.u32 %v67_v27, 16  ;;  %v84_v36 = vshrl.u32 %v68_v29, 16  ;;  %v85_v41 = vshrl.u32 %v69_v33, 16  ;;  %v274_v48 = vmul.f32 2.0, %v266_v35 }
  0x10   :  { %v86_v52 = vshrl.u32 %v70_v37, 16  ;;  %v87_v53 = vshrl.u32 %v71_v38, 16  ;;  %v88_v54 = vshrl.u32 %v72_v39, 16  ;;  %v89_v57 = vshrl.u32 %v73_v42, 16 }
  0x11   :  { %v99_v40 = vxor.u32 %v83_v32, %v67_v27  ;;  %v100_v46 = vxor.u32 %v84_v36, %v68_v29  ;;  %v101_v50 = vxor.u32 %v85_v41, %v69_v33  ;;  %v90_v58 = vshrl.u32 %v74_v43, 16  ;;  %v531_v59 = vld.sshfl [vmem:[#allocation1] sm:$0xff pattern:$0x75316420] }
  0x12   :  { %v533_v60 = vld.sshfl [vmem:[#allocation1 + $0x8] sm:$0xff pattern:$0x75316420]  ;;  %v535_v61 = vld.sshfl [vmem:[#allocation1 + $0x10] sm:$0xff pattern:$0x75316420]  ;;  %v102_v4 = vxor.u32 %v86_v52, %v70_v37  ;;  %v103_v9 = vxor.u32 %v87_v53, %v71_v38  ;;  %v104_v11 = vxor.u32 %v88_v54, %v72_v39  ;;  %v105_v12 = vxor.u32 %v89_v57, %v73_v42 }
  0x13   :  { %v115_v49 = vmul.u32 2246822507, %v99_v40  ;;  %v116_v51 = vmul.u32 2246822507, %v100_v46  ;;  %v117_v56 = vmul.u32 2246822507, %v101_v50  ;;  %v106_v17 = vxor.u32 %v90_v58, %v74_v43 }
  0x14   :  { %298 = vst [vmem:[#allocation1] ss:$2 sm:$0xff] %v271_v44  ;;  %v537_v0 = vld.sshfl [vmem:[#allocation1 + $0x18] sm:$0xff pattern:$0x75316420]  ;;  %v37_v13 = vadd.s32 1024, %v501_v2 }
  0x15   :  { %v131_v55 = vshrl.u32 %v115_v49, 13  ;;  %v132_v62 = vshrl.u32 %v116_v51, 13  ;;  %v539_v1 = vld.sshfl [vmem:[#allocation1 + $0x20] sm:$0xff pattern:$0x75316420]  ;;  %v133_v8 = vshrl.u32 %v117_v56, 13 }
  0x16   :  { %299 = vst [vmem:[#allocation1 + $0x10] ss:$2 sm:$0xff] %v272_v45  ;;  %v541_v6 = vld.sshfl [vmem:[#allocation1 + $0x28] sm:$0xff pattern:$0x75316420]  ;;  %v38_v18 = vadd.s32 1152, %v501_v2  ;;  %v56_v21 = vadd.s32 %v506_v5, %v37_v13 }
  0x17   :  { %v147_v63 = vxor.u32 %v131_v55, %v115_v49  ;;  %v148_v7 = vxor.u32 %v132_v62, %v116_v51  ;;  %300 = vst [vmem:[#allocation1 + $0x20] ss:$2 sm:$0xff] %v273_v47  ;;  %v543_v10 = vld.sshfl [vmem:[#allocation1 + $0x30] sm:$0xff pattern:$0x75316420]  ;;  %v149_v16 = vxor.u32 %v133_v8, %v117_v56 }
  0x18   :  { %v546_v14 = vld.sshfl [vmem:[#allocation1 + $0x38] sm:$0xff pattern:$0x75316420]  ;;  %v118_v20 = vmul.u32 2246822507, %v102_v4  ;;  %v57_v25 = vadd.s32 %v506_v5, %v38_v18  ;;  %v75_v8 = vxor.u32 %v503_v3, %v56_v21 }
  0x19   :  { %v163_v15 = vmul.u32 3266489909, %v147_v63  ;;  %301 = vst [vmem:[#allocation1 + $0x30] ss:$2 sm:$0xff] %v274_v48  ;;  %v164_v19 = vmul.u32 3266489909, %v148_v7 }
  0x1a   :  { %v165_v23 = vmul.u32 3266489909, %v149_v16  ;;  %v119_v24 = vmul.u32 2246822507, %v103_v9  ;;  %v134_v27 = vshrl.u32 %v118_v20, 13 }
  0x1b   :  { %v179_v22 = vshrl.u32 %v163_v15, 16  ;;  %v180_v26 = vshrl.u32 %v164_v19, 16  ;;  %v120_v28 = vmul.u32 2246822507, %v104_v11  ;;  %v121_v29 = vmul.u32 2246822507, %v105_v12 }
  0x1c   :  { %v181_v31 = vshrl.u32 %v165_v23, 16  ;;  %v135_v32 = vshrl.u32 %v119_v24, 13  ;;  %v122_v33 = vmul.u32 2246822507, %v106_v17  ;;  %v150_v35 = vxor.u32 %v134_v27, %v118_v20 }
  0x1d   :  { %v195_v30 = vxor.u32 %v179_v22, %v163_v15  ;;  %v196_v34 = vxor.u32 %v180_v26, %v164_v19  ;;  %v136_v36 = vshrl.u32 %v120_v28, 13  ;;  %v137_v37 = vshrl.u32 %v121_v29, 13 }
  0x1e   :  { %v197_v39 = vxor.u32 %v181_v31, %v165_v23  ;;  %v151_v40 = vxor.u32 %v135_v32, %v119_v24  ;;  %v138_v41 = vshrl.u32 %v122_v33, 13  ;;  %v166_v43 = vmul.u32 3266489909, %v150_v35 }
  0x1f   :  { %v408_v38 = vxor.u32 2147483648, %v195_v30  ;;  %v409_v42 = vxor.u32 2147483648, %v196_v34  ;;  %v152_v44 = vxor.u32 %v136_v36, %v120_v28  ;;  %v153_v45 = vxor.u32 %v137_v37, %v121_v29 }
  0x20   :  { %v410_v47 = vxor.u32 2147483648, %v197_v39  ;;  %v167_v48 = vmul.u32 3266489909, %v151_v40  ;;  %v154_v49 = vxor.u32 %v138_v41, %v122_v33  ;;  %v182_v51 = vshrl.u32 %v166_v43, 16 }
  0x21   :  { %vm551_vm1 = vcmp.ge.s32.totalorder %v408_v38, 0  ;;  %vm216_vm2 = vcmp.ge.s32.totalorder %v409_v42, 0  ;;  %v168_v52 = vmul.u32 3266489909, %v152_v44  ;;  %v169_v56 = vmul.u32 3266489909, %v153_v45 }
  0x22   :  { %v326_v50 = vsel %vm551_vm1, %v531_v59, 0.0  ;;  %v327_v53 = vsel %vm216_vm2, %v533_v60, 0.0  ;;  %vm559_vm3 = vcmp.ge.s32.totalorder %v410_v47, 0  ;;  %v183_v55 = vshrl.u32 %v167_v48, 16 }
  0x23   :  { %v358_v57 = vrot.slane %v327_v53, 4  ;;  %v198_v58 = vxor.u32 %v182_v51, %v166_v43  ;;  %v328_v62 = vsel %vm559_vm3, %v535_v61, 0.0  ;;  %v184_v63 = vshrl.u32 %v168_v52, 16 }
  0x24   :  { %v199_v4 = vxor.u32 %v183_v55, %v167_v48  ;;  %v170_v7 = vmul.u32 3266489909, %v154_v49  ;;  %v185_v59 = vshrl.u32 %v169_v56, 16  ;;  %v76_v12 = vxor.u32 %v503_v3, %v57_v25 }
  0x25   :  { %v367_v60 = vsel %vm366_vm0, %v326_v50, %v358_v57  ;;  %v411_v9 = vxor.u32 2147483648, %v198_v58  ;;  %v200_v11 = vxor.u32 %v184_v63, %v168_v52  ;;  %v91_v17 = vshrl.u32 %v75_v8, 16 }
  0x26   :  { %383 = vst [vmem:[#allocation7] sm:$0xff] %v367_v60  ;;  %v412_v13 = vxor.u32 2147483648, %v199_v4  ;;  %v186_v15 = vshrl.u32 %v170_v7, 16  ;;  %v201_v16 = vxor.u32 %v185_v59, %v169_v56  ;;  %v92_v61 = vshrl.u32 %v76_v12, 16 }
  0x27   :  { %vm222_vm4 = vcmp.ge.s32.totalorder %v411_v9, 0  ;;  %v413_v18 = vxor.u32 2147483648, %v200_v11  ;;  %v39_v19 = vadd.s32 1280, %v501_v2  ;;  %v107_v26 = vxor.u32 %v91_v17, %v75_v8 }
  0x28   :  { %v329_v20 = vsel %vm222_vm4, %v537_v0, 0.0  ;;  %vm571_vm5 = vcmp.ge.s32.totalorder %v412_v13, 0  ;;  %v202_v22 = vxor.u32 %v186_v15, %v170_v7  ;;  %v414_v23 = vxor.u32 2147483648, %v201_v16 }
  0x29   :  { %v359_v24 = vrot.slane %v329_v20, 4  ;;  %vm228_vm6 = vcmp.ge.s32.totalorder %v413_v18, 0  ;;  %v330_v25 = vsel %vm571_vm5, %v539_v1, 0.0  ;;  %v108_v29 = vxor.u32 %v92_v61, %v76_v12 }
  0x2a   :  { %v331_v27 = vsel %vm228_vm6, %v541_v6, 0.0  ;;  %vm579_vm7 = vcmp.ge.s32.totalorder %v414_v23, 0  ;;  %v415_v0 = vxor.u32 2147483648, %v202_v22  ;;  %v123_v33 = vmul.u32 2246822507, %v107_v26 }
  0x2b   :  { %v368_v30 = vsel %vm366_vm0, %v328_v62, %v359_v24  ;;  %v360_v31 = vrot.slane %v331_v27, 4  ;;  %v332_v32 = vsel %vm579_vm7, %v543_v10, 0.0  ;;  %v124_v1 = vmul.u32 2246822507, %v108_v29 }
  0x2c   :  { %384 = vst [vmem:[#allocation7 + $0x8] sm:$0xff] %v368_v30  ;;  %vm234_vm8 = vcmp.ge.s32.totalorder %v415_v0, 0  ;;  %v40_v34 = vadd.s32 1408, %v501_v2  ;;  %v58_v6 = vadd.s32 %v506_v5, %v39_v19  ;;  %v139_v37 = vshrl.u32 %v123_v33, 13 }
  0x2d   :  { %v369_v35 = vsel %vm366_vm0, %v330_v25, %v360_v31  ;;  %v333_v36 = vsel %vm234_vm8, %v546_v14, 0.0  ;;  %v41_v38 = vadd.s32 1536, %v501_v2  ;;  %v140_v40 = vshrl.u32 %v124_v1, 13  ;;  %v302_v24 = vld.sshfl [vmem:[#allocation1] sm:$0xff pattern:$0x75316420] }
  0x2e   :  { %385 = vst [vmem:[#allocation7 + $0x10] sm:$0xff] %v369_v35  ;;  %v361_v39 = vrot.slane %v333_v36, 4  ;;  %v59_v10 = vadd.s32 %v506_v5, %v40_v34  ;;  %v77_v41 = vxor.u32 %v503_v3, %v58_v6  ;;  %v155_v42 = vxor.u32 %v139_v37, %v123_v33 }
  0x2f   :  { %v42_v43 = vadd.s32 1664, %v501_v2  ;;  %v60_v44 = vadd.s32 %v506_v5, %v41_v38  ;;  %v43_v45 = vadd.s32 1792, %v501_v2  ;;  %v156_v14 = vxor.u32 %v140_v40, %v124_v1 }
  0x30   :  { %v370_v46 = vsel %vm366_vm0, %v332_v32, %v361_v39  ;;  %v78_v47 = vxor.u32 %v503_v3, %v59_v10  ;;  %v93_v48 = vshrl.u32 %v77_v41, 16  ;;  %v171_v49 = vmul.u32 3266489909, %v155_v42 }
  0x31   :  { %386 = vst [vmem:[#allocation7 + $0x18] sm:$0xff] %v370_v46  ;;  %v61_v50 = vadd.s32 %v506_v5, %v42_v43  ;;  %v79_v51 = vxor.u32 %v503_v3, %v60_v44  ;;  %v44_v52 = vadd.s32 1920, %v501_v2  ;;  %v172_v53 = vmul.u32 3266489909, %v156_v14 }
  0x32   :  { %v94_v54 = vshrl.u32 %v78_v47, 16  ;;  %v109_v55 = vxor.u32 %v93_v48, %v77_v41  ;;  %v62_v56 = vadd.s32 %v506_v5, %v43_v45  ;;  %v187_v57 = vshrl.u32 %v171_v49, 16 }
  0x33   :  { %v80_v58 = vxor.u32 %v503_v3, %v61_v50  ;;  %v95_v62 = vshrl.u32 %v79_v51, 16  ;;  %v63_v63 = vadd.s32 %v506_v5, %v44_v52  ;;  %v188_v4 = vshrl.u32 %v172_v53, 16  ;;  %v303_v5 = vld.sshfl [vmem:[#allocation1 + $0x8] sm:$0xff pattern:$0x75316420] }
  0x34   :  { %v110_v7 = vxor.u32 %v94_v54, %v78_v47  ;;  %v125_v59 = vmul.u32 2246822507, %v109_v55  ;;  %v81_v8 = vxor.u32 %v503_v3, %v62_v56  ;;  %v203_v60 = vxor.u32 %v187_v57, %v171_v49  ;;  %v304_v57 = vld.sshfl [vmem:[#allocation1 + $0x10] sm:$0xff pattern:$0x75316420] }
  0x35   :  { %v96_v9 = vshrl.u32 %v80_v58, 16  ;;  %v111_v11 = vxor.u32 %v95_v62, %v79_v51  ;;  %v82_v2 = vxor.u32 %v503_v3, %v63_v63  ;;  %v204_v12 = vxor.u32 %v188_v4, %v172_v53  ;;  %v305_v51 = vld.sshfl [vmem:[#allocation1 + $0x18] sm:$0xff pattern:$0x75316420] }
  0x36   :  { %v126_v13 = vmul.u32 2246822507, %v110_v7  ;;  %v141_v15 = vshrl.u32 %v125_v59, 13  ;;  %v97_v16 = vshrl.u32 %v81_v8, 16  ;;  %v416_v17 = vxor.u32 2147483648, %v203_v60 }
  0x37   :  { %v112_v18 = vxor.u32 %v96_v9, %v80_v58  ;;  %v127_v61 = vmul.u32 2246822507, %v111_v11  ;;  %v98_v19 = vshrl.u32 %v82_v2, 16  ;;  %v417_v20 = vxor.u32 2147483648, %v204_v12 }
  0x38   :  { %v142_v21 = vshrl.u32 %v126_v13, 13  ;;  %v157_v22 = vxor.u32 %v141_v15, %v125_v59  ;;  %v113_v23 = vxor.u32 %v97_v16, %v81_v8  ;;  %vm607_vm9 = vcmp.ge.s32.totalorder %v416_v17, 0  ;;  %v307_v4 = vld.sshfl [vmem:[#allocation1 + $0x28] sm:$0xff pattern:$0x75316420] }
  0x39   :  { %v128_v25 = vmul.u32 2246822507, %v112_v18  ;;  %v143_v26 = vshrl.u32 %v127_v61, 13  ;;  %v114_v27 = vxor.u32 %v98_v19, %v82_v2  ;;  %vm240_vm10 = vcmp.ge.s32.totalorder %v417_v20, 0 }
  0x3a   :  { %v158_v3 = vxor.u32 %v142_v21, %v126_v13  ;;  %v173_v0 = vmul.u32 3266489909, %v157_v22  ;;  %v335_v29 = vsel %vm240_vm10, %v303_v5, 0.0  ;;  %v129_v32 = vmul.u32 2246822507, %v113_v23 }
  0x3b   :  { %v144_v30 = vshrl.u32 %v128_v25, 13  ;;  %v159_v31 = vxor.u32 %v143_v26, %v127_v61  ;;  %v362_v33 = vrot.slane %v335_v29, 4  ;;  %v130_v6 = vmul.u32 2246822507, %v114_v27 }
  0x3c   :  { %v174_v1 = vmul.u32 3266489909, %v158_v3  ;;  %v189_v34 = vshrl.u32 %v173_v0, 16  ;;  %v334_v35 = vsel %vm607_vm9, %v302_v24, 0.0  ;;  %v145_v38 = vshrl.u32 %v129_v32, 13 }
  0x3d   :  { %v160_v36 = vxor.u32 %v144_v30, %v128_v25  ;;  %v175_v37 = vmul.u32 3266489909, %v159_v31  ;;  %v371_v39 = vsel %vm366_vm0, %v334_v35, %v362_v33  ;;  %v146_v41 = vshrl.u32 %v130_v6, 13  ;;  %v306_v8 = vld.sshfl [vmem:[#allocation1 + $0x20] sm:$0xff pattern:$0x75316420] }
  0x3e   :  { %v190_v40 = vshrl.u32 %v174_v1, 16  ;;  %v205_v10 = vxor.u32 %v189_v34, %v173_v0  ;;  %387 = vst [vmem:[#allocation7 + $0x20] sm:$0xff] %v371_v39  ;;  %v161_v44 = vxor.u32 %v145_v38, %v129_v32  ;;  %v309_v16 = vld.sshfl [vmem:[#allocation1 + $0x38] sm:$0xff pattern:$0x75316420] }
  0x3f   :  { %v176_v42 = vmul.u32 3266489909, %v160_v36  ;;  %v191_v43 = vshrl.u32 %v175_v37, 16  ;;  %v162_v14 = vxor.u32 %v146_v41, %v130_v6  ;;  %v308_v61 = vld.sshfl [vmem:[#allocation1 + $0x30] sm:$0xff pattern:$0x75316420] }
  0x40   :  { %v206_v45 = vxor.u32 %v190_v40, %v174_v1  ;;  %v418_v46 = vxor.u32 2147483648, %v205_v10  ;;  %v177_v49 = vmul.u32 3266489909, %v161_v44 }
  0x41   :  { %v192_v47 = vshrl.u32 %v176_v42, 16  ;;  %v207_v48 = vxor.u32 %v191_v43, %v175_v37  ;;  %v178_v52 = vmul.u32 3266489909, %v162_v14 }
  0x42   :  { %v419_v50 = vxor.u32 2147483648, %v206_v45  ;;  %v193_v55 = vshrl.u32 %v177_v49, 16  ;;  %vm614_vm11 = vcmp.ge.s32.totalorder %v418_v46, 0 }
  0x43   :  { %v208_v53 = vxor.u32 %v192_v47, %v176_v42  ;;  %v420_v54 = vxor.u32 2147483648, %v207_v48  ;;  %v194_v58 = vshrl.u32 %v178_v52, 16  ;;  %v336_v9 = vsel %vm614_vm11, %v304_v57, 0.0 }
  0x44   :  { %vm246_vm12 = vcmp.ge.s32.totalorder %v419_v50, 0  ;;  %v209_v7 = vxor.u32 %v193_v55, %v177_v49 }
  0x45   :  { %v337_v62 = vsel %vm246_vm12, %v305_v51, 0.0  ;;  %v421_v63 = vxor.u32 2147483648, %v208_v53  ;;  %v210_v60 = vxor.u32 %v194_v58, %v178_v52  ;;  %vm620_vm13 = vcmp.ge.s32.totalorder %v420_v54, 0 }
  0x46   :  { %v363_v59 = vrot.slane %v337_v62, 4  ;;  %v422_v2 = vxor.u32 2147483648, %v209_v7  ;;  %v338_v18 = vsel %vm620_vm13, %v306_v8, 0.0 }
  0x47   :  { %vm252_vm14 = vcmp.ge.s32.totalorder %v421_v63, 0  ;;  %v423_v15 = vxor.u32 2147483648, %v210_v60 }
  0x48   :  { %v372_v12 = vsel %vm366_vm0, %v336_v9, %v363_v59  ;;  %v339_v13 = vsel %vm252_vm14, %v307_v4, 0.0  ;;  %vm255_vm15 = vcmp.ge.s32.totalorder %v422_v2, 0 }
  0x49   :  { %388 = vst [vmem:[#allocation7 + $0x28] sm:$0xff] %v372_v12  ;;  %v364_v17 = vrot.slane %v339_v13, 4  ;;  %vm258_vm1 = vcmp.ge.s32.totalorder %v423_v15, 0  ;;  %v340_v21 = vsel %vm255_vm15, %v308_v61, 0.0 }
  0x4a   :  { %v341_v20 = vsel %vm258_vm1, %v309_v16, 0.0 }
  0x4b   :  { %v373_v19 = vsel %vm366_vm0, %v338_v18, %v364_v17  ;;  %v365_v5 = vrot.slane %v341_v20, 4 }
  0x4c   :  { %389 = vst [vmem:[#allocation7 + $0x30] sm:$0xff] %v373_v19 }
  0x4d   :  { %v374_v22 = vsel %vm366_vm0, %v340_v21, %v365_v5 }
  0x4e   :  { %390 = vst [vmem:[#allocation7 + $0x38] sm:$0xff] %v374_v22 }
  0x4f   :  { %401 = dma.vmem_to_hbm [thread:$0]  %s397_s1, 1024, %s399_s19, [#allocation6]  }
  0x50   :  { %476 = dma.done.wait [#allocation6], 1024  }
  0x51   :  { %477 = vsyncadd [#allocation6], 4294966272 }
  0x52   :  { %406 = vsyncpa [#allocation5], 1 }
  0x53   :  { %407 = vsyncpa [#allocation6], 1 }

</bundles_post_ra>
